<compile_context>
chip_gen: v6e
topology: v6e:2x2x1
jax: 0.10.0
libtpu: 0.0.40
codegen_flags: <defaults>
</compile_context>

<pallas_src>
import jax
import jax.numpy as jnp
from jax.experimental import pallas as pl
from jax.experimental.pallas import tpu as pltpu

# --- model hyperparameters (from NST_Net_1d.__init__) ---
C_IN = 1
C_OUT = 3          # Conv1d out channels
KSIZE = 300        # Conv1d kernel size
STRIDE = 70        # Conv1d stride
POOL = 2           # MaxPool1d(2)
FC_IN = 198        # Linear(198, 2)  => pooled length 66, conv length 132
FC_OUT = 2
BN_EPS = 1e-5
N_Q = -(-KSIZE // STRIDE)   # 5 stride-wide weight groups (last one zero-padded)


def _nst_kernel(xt_ref, wq_ref, shift_ref, wfc_ref, fcb_ref, out_ref):
    """One batch element per grid step.

    xt_ref    : (1, STRIDE, S_PAD)      xt[0, r, s] = x[s*STRIDE + r]
    wq_ref    : (N_Q, C_OUT, STRIDE)    conv weight * BN scale, grouped by q
    shift_ref : (C_OUT, 1)              folded conv-bias + BN(eval) shift
    wfc_ref   : (FC_OUT, C_OUT, T_CONV) FC weight, zero on odd conv-lane slots
    fcb_ref   : (1, FC_OUT)             FC bias
    out_ref   : (1, 1, FC_OUT)
    """
    t_conv = wfc_ref.shape[-1]
    c_out = wq_ref.shape[1]

    # Conv1d(stride=70) as N_Q accumulating MXU matmuls over lane-shifted
    # slices of the (70, S) reshaped signal -> lane-dense (C_OUT, T_CONV+1).
    acc = jnp.zeros((c_out, t_conv + 1), jnp.float32)
    for q in range(N_Q):                                      # static unroll (5)
        zq = xt_ref[0, :, pl.ds(q, t_conv + 1)]               # (STRIDE, T_CONV+1)
        acc = acc + jnp.dot(wq_ref[q], zq,
                            preferred_element_type=jnp.float32)

    # BatchNorm (eval; scale pre-folded into the weights) + ReLU.
    act = jnp.maximum(acc + shift_ref[...], 0.0)              # (C_OUT, T_CONV+1)

    # MaxPool1d(2): max with the one-lane-shifted copy; even lanes hold the
    # pooled values, odd lanes are killed by the zero-interleaved FC weight.
    m = jnp.maximum(act[:, :t_conv], act[:, 1:t_conv + 1])    # (C_OUT, T_CONV)

    # Linear(198, 2): elementwise multiply + full reduction per output unit.
    prod = wfc_ref[...] * m[None, :, :]                       # (FC_OUT, C_OUT, T_CONV)
    red = jnp.sum(jnp.sum(prod, axis=2), axis=1)              # (FC_OUT,)
    out_ref[0, :, :] = red[None, :] + fcb_ref[...]
    # TODO(synk): Dropout(0.5) is identity in eval mode; no stochastic masking.


def nst_net_1d_forward(x, params):
    """Eval-mode forward of NST_Net_1d.  x: (B, 1, L) float32, NCL layout."""
    conv_w, conv_b, bn_gamma, bn_beta, bn_mean, bn_var, fc_w, fc_b = params
    B, cin, L = x.shape
    assert cin == C_IN
    t_conv = (L - KSIZE) // STRIDE + 1           # 132
    t_pool = t_conv // POOL                      # 66
    assert C_OUT * t_pool == FC_IN, "input length inconsistent with Linear(198, 2)"

    # --- glue (plain JAX, same byte count as x: no im2col replication) ---
    s_pad = t_conv + N_Q                          # 137
    l_pad = s_pad * STRIDE                        # 9590 (pad only feeds unused lanes)
    x2 = jnp.pad(x[:, 0, :].astype(jnp.float32), ((0, 0), (0, l_pad - L)))
    xt = x2.reshape(B, s_pad, STRIDE).transpose(0, 2, 1)          # (B, STRIDE, s_pad)

    # Conv weight with BN(eval) scale folded in, regrouped into N_Q stride-wide
    # blocks (last block zero-padded from 20 -> 70 taps).
    scale = bn_gamma / jnp.sqrt(bn_var + BN_EPS)                  # (C_OUT,)
    shift = (conv_b - bn_mean) * scale + bn_beta                  # (C_OUT,)
    w = conv_w[:, 0, :] * scale[:, None]                          # (C_OUT, KSIZE)
    w = jnp.pad(w, ((0, 0), (0, N_Q * STRIDE - KSIZE)))           # (C_OUT, N_Q*STRIDE)
    wq = w.reshape(C_OUT, N_Q, STRIDE).transpose(1, 0, 2)         # (N_Q, C_OUT, STRIDE)
    shift2 = shift[:, None].astype(jnp.float32)                   # (C_OUT, 1)

    # FC weight in PyTorch channel-major flatten order, placed on the even conv
    # lanes (odd lanes zero) so the pooled values need no strided extraction.
    w_jcp = fc_w.reshape(FC_OUT, C_OUT, t_pool)                   # (J, C, Tp)
    wfc = jnp.zeros((FC_OUT, C_OUT, t_conv), jnp.float32)
    wfc = wfc.at[:, :, 0::POOL].set(w_jcp.astype(jnp.float32))
    fcb2 = fc_b[None, :].astype(jnp.float32)                      # (1, J)

    out = pl.pallas_call(
        _nst_kernel,
        out_shape=jax.ShapeDtypeStruct((B, 1, FC_OUT), jnp.float32),
        grid=(B,),
        in_specs=[
            pl.BlockSpec((1, STRIDE, s_pad), lambda b: (b, 0, 0)),
            pl.BlockSpec((N_Q, C_OUT, STRIDE), lambda b: (0, 0, 0)),
            pl.BlockSpec((C_OUT, 1), lambda b: (0, 0)),
            pl.BlockSpec((FC_OUT, C_OUT, t_conv), lambda b: (0, 0, 0)),
            pl.BlockSpec((1, FC_OUT), lambda b: (0, 0)),
        ],
        out_specs=pl.BlockSpec((1, 1, FC_OUT), lambda b: (b, 0, 0)),
        compiler_params=pltpu.CompilerParams(
            dimension_semantics=("parallel",)),
    )(xt, wq, shift2, wfc, fcb2)
    return out[:, 0, :]


def init_params(key):
    """Deterministic init matching the module's __init__ (kaiming fan_out for conv,
    BN weight=1 / bias=0, PyTorch-default uniform for conv bias and Linear)."""
    k1, k2, k3, k4 = jax.random.split(key, 4)
    fan_out = C_OUT * KSIZE
    conv_w = jax.random.normal(k1, (C_OUT, C_IN, KSIZE), jnp.float32) * jnp.sqrt(2.0 / fan_out)
    bnd_c = 1.0 / jnp.sqrt(C_IN * KSIZE)
    conv_b = jax.random.uniform(k2, (C_OUT,), jnp.float32, -bnd_c, bnd_c)
    bn_gamma = jnp.ones((C_OUT,), jnp.float32)
    bn_beta = jnp.zeros((C_OUT,), jnp.float32)
    bn_mean = jnp.zeros((C_OUT,), jnp.float32)   # running stats (eval mode)
    bn_var = jnp.ones((C_OUT,), jnp.float32)
    bnd_f = 1.0 / jnp.sqrt(FC_IN)
    fc_w = jax.random.uniform(k3, (FC_OUT, FC_IN), jnp.float32, -bnd_f, bnd_f)
    fc_b = jax.random.uniform(k4, (FC_OUT,), jnp.float32, -bnd_f, bnd_f)
    return (conv_w, conv_b, bn_gamma, bn_beta, bn_mean, bn_var, fc_w, fc_b)


def reference_forward(x, params):
    """Pure-JAX eval-mode reference (for correctness check)."""
    conv_w, conv_b, bn_gamma, bn_beta, bn_mean, bn_var, fc_w, fc_b = params
    y = jax.lax.conv_general_dilated(
        x, conv_w, window_strides=(STRIDE,), padding='VALID',
        dimension_numbers=('NCH', 'OIH', 'NCH'),
        precision=jax.lax.Precision.HIGHEST)
    y = y + conv_b[None, :, None]
    y = (y - bn_mean[None, :, None]) / jnp.sqrt(bn_var[None, :, None] + BN_EPS)
    y = y * bn_gamma[None, :, None] + bn_beta[None, :, None]
    y = jnp.maximum(y, 0.0)
    B, C, T = y.shape
    tp = T // POOL
    y = y[:, :, :tp * POOL].reshape(B, C, tp, POOL).max(-1)
    flat = y.reshape(B, C * tp)                               # channel-major flatten
    return jnp.dot(flat, fc_w.T, precision=jax.lax.Precision.HIGHEST) + fc_b


if __name__ == "__main__":
    B = 2
    L = STRIDE * 131 + KSIZE        # 9470 -> conv length 132, pooled 66, flat 198
    key = jax.random.PRNGKey(0)
    kx, kp = jax.random.split(key)
    x = jax.random.normal(kx, (B, C_IN, L), jnp.float32)
    params = init_params(kp)

    fwd = jax.jit(nst_net_1d_forward)
    out = jax.block_until_ready(fwd(x, params))

    ref = reference_forward(x, params)
    assert out.shape == (B, FC_OUT)
    assert jnp.allclose(out, ref, rtol=5e-3, atol=5e-3), (out, ref)
    print("KERNEL_OK")
</pallas_src>

<mosaic_0001>
module attributes {stable_mosaic.version = 11 : i64} {
  func.func @_nst_kernel(%arg0: i32, %arg1: memref<1x70x137xf32, #tpu.memory_space<vmem>>, %arg2: memref<5x3x70xf32, #tpu.memory_space<vmem>>, %arg3: memref<3x1xf32, #tpu.memory_space<vmem>>, %arg4: memref<2x3x132xf32, #tpu.memory_space<vmem>>, %arg5: memref<1x2xf32, #tpu.memory_space<vmem>>, %arg6: memref<1x1x2xf32, #tpu.memory_space<vmem>>) attributes {dimension_semantics = [#tpu.dimension_semantics<parallel>], iteration_bounds = array<i64: 2>, scalar_prefetch = 0 : i64, scratch_operands = 0 : i64, tpu.core_type = #tpu.core_type<tc>, window_params = [{transform_indices = @transform_0, window_bounds = array<i64: 1, 70, 137>}, {pipeline_mode = #tpu.pipeline_mode<synchronous>, transform_indices = @transform_1, window_bounds = array<i64: 5, 3, 70>}, {pipeline_mode = #tpu.pipeline_mode<synchronous>, transform_indices = @transform_2, window_bounds = array<i64: 3, 1>}, {pipeline_mode = #tpu.pipeline_mode<synchronous>, transform_indices = @transform_3, window_bounds = array<i64: 2, 3, 132>}, {pipeline_mode = #tpu.pipeline_mode<synchronous>, transform_indices = @transform_4, window_bounds = array<i64: 1, 2>}, {transform_indices = @transform_5, window_bounds = array<i64: 1, 1, 2>}]} {
    %cst = arith.constant 0.000000e+00 : f32
    %0 = vector.broadcast %cst : f32 to vector<3x133xf32>
    %c0 = arith.constant 0 : index
    %c0_0 = arith.constant 0 : index
    %c0_1 = arith.constant 0 : index
    %1 = vector.load %arg1[%c0, %c0_0, %c0_1] : memref<1x70x137xf32, #tpu.memory_space<vmem>>, vector<1x70x133xf32>
    %2 = vector.shape_cast %1 : vector<1x70x133xf32> to vector<70x133xf32>
    %c0_2 = arith.constant 0 : index
    %c0_3 = arith.constant 0 : index
    %c0_4 = arith.constant 0 : index
    %3 = vector.load %arg2[%c0_2, %c0_3, %c0_4] : memref<5x3x70xf32, #tpu.memory_space<vmem>>, vector<1x3x70xf32>
    %4 = vector.shape_cast %3 : vector<1x3x70xf32> to vector<3x70xf32>
    %cst_5 = arith.constant dense<0.000000e+00> : vector<3x133xf32>
    %5 = tpu.matmul %4, %2, %cst_5 {dimension_numbers = #tpu.dot_dimension_numbers<[1], [0], [0], [1], [0, 0, 1, 1], [], []>} : vector<3x70xf32>, vector<70x133xf32>, vector<3x133xf32> -> vector<3x133xf32>
    %6 = arith.addf %0, %5 : vector<3x133xf32>
    %c0_6 = arith.constant 0 : index
    %c0_7 = arith.constant 0 : index
    %c1 = arith.constant 1 : index
    %7 = vector.load %arg1[%c0_6, %c0_7, %c1] : memref<1x70x137xf32, #tpu.memory_space<vmem>>, vector<1x70x133xf32>
    %8 = vector.shape_cast %7 : vector<1x70x133xf32> to vector<70x133xf32>
    %c1_8 = arith.constant 1 : index
    %c0_9 = arith.constant 0 : index
    %c0_10 = arith.constant 0 : index
    %9 = vector.load %arg2[%c1_8, %c0_9, %c0_10] : memref<5x3x70xf32, #tpu.memory_space<vmem>>, vector<1x3x70xf32>
    %10 = vector.shape_cast %9 : vector<1x3x70xf32> to vector<3x70xf32>
    %cst_11 = arith.constant dense<0.000000e+00> : vector<3x133xf32>
    %11 = tpu.matmul %10, %8, %cst_11 {dimension_numbers = #tpu.dot_dimension_numbers<[1], [0], [0], [1], [0, 0, 1, 1], [], []>} : vector<3x70xf32>, vector<70x133xf32>, vector<3x133xf32> -> vector<3x133xf32>
    %12 = arith.addf %6, %11 : vector<3x133xf32>
    %c0_12 = arith.constant 0 : index
    %c0_13 = arith.constant 0 : index
    %c2 = arith.constant 2 : index
    %13 = vector.load %arg1[%c0_12, %c0_13, %c2] : memref<1x70x137xf32, #tpu.memory_space<vmem>>, vector<1x70x133xf32>
    %14 = vector.shape_cast %13 : vector<1x70x133xf32> to vector<70x133xf32>
    %c2_14 = arith.constant 2 : index
    %c0_15 = arith.constant 0 : index
    %c0_16 = arith.constant 0 : index
    %15 = vector.load %arg2[%c2_14, %c0_15, %c0_16] : memref<5x3x70xf32, #tpu.memory_space<vmem>>, vector<1x3x70xf32>
    %16 = vector.shape_cast %15 : vector<1x3x70xf32> to vector<3x70xf32>
    %cst_17 = arith.constant dense<0.000000e+00> : vector<3x133xf32>
    %17 = tpu.matmul %16, %14, %cst_17 {dimension_numbers = #tpu.dot_dimension_numbers<[1], [0], [0], [1], [0, 0, 1, 1], [], []>} : vector<3x70xf32>, vector<70x133xf32>, vector<3x133xf32> -> vector<3x133xf32>
    %18 = arith.addf %12, %17 : vector<3x133xf32>
    %c0_18 = arith.constant 0 : index
    %c0_19 = arith.constant 0 : index
    %c3 = arith.constant 3 : index
    %19 = vector.load %arg1[%c0_18, %c0_19, %c3] : memref<1x70x137xf32, #tpu.memory_space<vmem>>, vector<1x70x133xf32>
    %20 = vector.shape_cast %19 : vector<1x70x133xf32> to vector<70x133xf32>
    %c3_20 = arith.constant 3 : index
    %c0_21 = arith.constant 0 : index
    %c0_22 = arith.constant 0 : index
    %21 = vector.load %arg2[%c3_20, %c0_21, %c0_22] : memref<5x3x70xf32, #tpu.memory_space<vmem>>, vector<1x3x70xf32>
    %22 = vector.shape_cast %21 : vector<1x3x70xf32> to vector<3x70xf32>
    %cst_23 = arith.constant dense<0.000000e+00> : vector<3x133xf32>
    %23 = tpu.matmul %22, %20, %cst_23 {dimension_numbers = #tpu.dot_dimension_numbers<[1], [0], [0], [1], [0, 0, 1, 1], [], []>} : vector<3x70xf32>, vector<70x133xf32>, vector<3x133xf32> -> vector<3x133xf32>
    %24 = arith.addf %18, %23 : vector<3x133xf32>
    %c0_24 = arith.constant 0 : index
    %c0_25 = arith.constant 0 : index
    %c4 = arith.constant 4 : index
    %25 = vector.load %arg1[%c0_24, %c0_25, %c4] : memref<1x70x137xf32, #tpu.memory_space<vmem>>, vector<1x70x133xf32>
    %26 = vector.shape_cast %25 : vector<1x70x133xf32> to vector<70x133xf32>
    %c4_26 = arith.constant 4 : index
    %c0_27 = arith.constant 0 : index
    %c0_28 = arith.constant 0 : index
    %27 = vector.load %arg2[%c4_26, %c0_27, %c0_28] : memref<5x3x70xf32, #tpu.memory_space<vmem>>, vector<1x3x70xf32>
    %28 = vector.shape_cast %27 : vector<1x3x70xf32> to vector<3x70xf32>
    %cst_29 = arith.constant dense<0.000000e+00> : vector<3x133xf32>
    %29 = tpu.matmul %28, %26, %cst_29 {dimension_numbers = #tpu.dot_dimension_numbers<[1], [0], [0], [1], [0, 0, 1, 1], [], []>} : vector<3x70xf32>, vector<70x133xf32>, vector<3x133xf32> -> vector<3x133xf32>
    %30 = arith.addf %24, %29 : vector<3x133xf32>
    %c0_30 = arith.constant 0 : index
    %c0_31 = arith.constant 0 : index
    %31 = vector.load %arg3[%c0_30, %c0_31] : memref<3x1xf32, #tpu.memory_space<vmem>>, vector<3x1xf32>
    %32 = vector.broadcast %31 : vector<3x1xf32> to vector<3x133xf32>
    %33 = arith.addf %30, %32 : vector<3x133xf32>
    %cst_32 = arith.constant 0.000000e+00 : f32
    %34 = vector.broadcast %cst_32 : f32 to vector<3x133xf32>
    %35 = arith.maximumf %33, %34 : vector<3x133xf32>
    %36 = vector.extract_strided_slice %35 {offsets = [0, 0], sizes = [3, 132], strides = [1, 1]} : vector<3x133xf32> to vector<3x132xf32>
    %37 = vector.extract_strided_slice %35 {offsets = [0, 1], sizes = [3, 132], strides = [1, 1]} : vector<3x133xf32> to vector<3x132xf32>
    %38 = arith.maximumf %36, %37 : vector<3x132xf32>
    %c0_33 = arith.constant 0 : index
    %c0_34 = arith.constant 0 : index
    %c0_35 = arith.constant 0 : index
    %39 = vector.load %arg4[%c0_33, %c0_34, %c0_35] : memref<2x3x132xf32, #tpu.memory_space<vmem>>, vector<2x3x132xf32>
    %40 = vector.shape_cast %38 : vector<3x132xf32> to vector<1x3x132xf32>
    %41 = vector.broadcast %40 : vector<1x3x132xf32> to vector<2x3x132xf32>
    %42 = arith.mulf %39, %41 : vector<2x3x132xf32>
    %cst_36 = arith.constant dense<0.000000e+00> : vector<2x3xf32>
    %43 = vector.multi_reduction <add>, %42, %cst_36 [2] : vector<2x3x132xf32> to vector<2x3xf32>
    %cst_37 = arith.constant dense<0.000000e+00> : vector<2xf32>
    %44 = vector.multi_reduction <add>, %43, %cst_37 [1] : vector<2x3xf32> to vector<2xf32>
    %45 = vector.shape_cast %44 : vector<2xf32> to vector<1x2xf32>
    %c0_38 = arith.constant 0 : index
    %c0_39 = arith.constant 0 : index
    %46 = vector.load %arg5[%c0_38, %c0_39] : memref<1x2xf32, #tpu.memory_space<vmem>>, vector<1x2xf32>
    %47 = arith.addf %45, %46 : vector<1x2xf32>
    %c0_40 = arith.constant 0 : index
    %c0_41 = arith.constant 0 : index
    %c0_42 = arith.constant 0 : index
    %48 = vector.load %arg6[%c0_40, %c0_41, %c0_42] : memref<1x1x2xf32, #tpu.memory_space<vmem>>, vector<1x1x2xf32>
    %49 = vector.shape_cast %48 : vector<1x1x2xf32> to vector<1x2xf32>
    %50 = vector.shape_cast %47 : vector<1x2xf32> to vector<1x1x2xf32>
    tpu.vector_store %arg6[%c0_40, %c0_41, %c0_42], %50 {strides = array<i32>} : memref<1x1x2xf32, #tpu.memory_space<vmem>>, vector<1x1x2xf32>,
    return
  }
  func.func @transform_0(%arg0: i32) -> (i32, i32, i32) {
    %c0_i32 = arith.constant 0 : i32
    %c0_i32_0 = arith.constant 0 : i32
    %c0_i32_1 = arith.constant 0 : i32
    return %arg0, %c0_i32, %c0_i32_0 : i32, i32, i32
  }
  func.func @transform_1(%arg0: i32) -> (i32, i32, i32) {
    %c0_i32 = arith.constant 0 : i32
    %c0_i32_0 = arith.constant 0 : i32
    %c0_i32_1 = arith.constant 0 : i32
    %c0_i32_2 = arith.constant 0 : i32
    return %c0_i32, %c0_i32_0, %c0_i32_1 : i32, i32, i32
  }
  func.func @transform_2(%arg0: i32) -> (i32, i32) {
    %c0_i32 = arith.constant 0 : i32
    %c0_i32_0 = arith.constant 0 : i32
    %c0_i32_1 = arith.constant 0 : i32
    return %c0_i32, %c0_i32_0 : i32, i32
  }
  func.func @transform_3(%arg0: i32) -> (i32, i32, i32) {
    %c0_i32 = arith.constant 0 : i32
    %c0_i32_0 = arith.constant 0 : i32
    %c0_i32_1 = arith.constant 0 : i32
    %c0_i32_2 = arith.constant 0 : i32
    return %c0_i32, %c0_i32_0, %c0_i32_1 : i32, i32, i32
  }
  func.func @transform_4(%arg0: i32) -> (i32, i32) {
    %c0_i32 = arith.constant 0 : i32
    %c0_i32_0 = arith.constant 0 : i32
    %c0_i32_1 = arith.constant 0 : i32
    return %c0_i32, %c0_i32_0 : i32, i32
  }
  func.func @transform_5(%arg0: i32) -> (i32, i32, i32) {
    %c0_i32 = arith.constant 0 : i32
    %c0_i32_0 = arith.constant 0 : i32
    %c0_i32_1 = arith.constant 0 : i32
    return %arg0, %c0_i32, %c0_i32_0 : i32, i32, i32
  }
}

</mosaic_0001>

<bundles_post_ra>
// kernel: nst_net_1d_forward.1
= control target key start
LH: loop header
LB: loop body
LE: loop exit
PB: predicated region body
PF: predicated region fallthrough
CT: control target
= control target key end

     0   :  { %10 = vsyncpa [#allocation3], 0  ;;  %s1617_s0 = inlined_call_operand.vmem [shape: f32[2,70,137], index: 0, kind: input, shape index: {}]   ;;  %s1618_s1 = inlined_call_operand.vmem [shape: f32[5,3,70], index: 1, kind: input, shape index: {}]   ;;  %s1619_s2 = inlined_call_operand.vmem [shape: f32[3,1], index: 2, kind: input, shape index: {}]   ;;  %s1620_s3 = inlined_call_operand.vmem [shape: f32[2,3,132], index: 3, kind: input, shape index: {}]   ;;  %s1621_s4 = inlined_call_operand.vmem [shape: f32[1,2], index: 4, kind: input, shape index: {}]   ;;  %s1622_s5 = inlined_call_operand.hbm [shape: f32[2,1,2], index: 5, kind: output, shape index: {}]  }
   0x1   :  { %12 = vsyncpa [#allocation3 + $0x1], 0  ;;  %s1244_s18 = smov 0   ;;  %s1246_s19 = smov 0  }
   0x2   :  { %s1248_s20 = smov 0   ;;  %s1250_s21 = smov 0  }
   0x3 LB: > { %s1265_s22 = sadd.s32 4294967295, %s1205_s21   ;;  %s1069_s23 = sadd.s32 4294967294, %s1205_s21   ;;  %s1205_s21 = sphi %s1250_s21, %s1628_s21   ;;  %s1201_s20 = sphi %s1248_s20, %s1627_s20   ;;  %s1197_s19 = sphi %s1246_s19, %s1626_s19   ;;  %s1193_s18 = sphi %s1244_s18, %s1625_s18  }
   0x4   : > { %s1269_s24 = sadd.s32 1, %s1205_s21   ;;  %s135_s25 = sadd.s32 1, %s1201_s20 }
   0x5   : > { %s132_s26 = ssub.s32 %s1205_s21, %s1269_s24  ;;  %p145_p0 = scmp.ne.s32.totalorder %s1201_s20, %s1197_s19 }
   0x6   : > { %p133_p1 = scmp.eq.s32.totalorder %s132_s26, 0  ;;  %p146_p2 = scmp.eq.s32.totalorder %s1265_s22, 1 }
   0x7   : > { %p151_p3 = scmp.ne.s32.totalorder %s1197_s19, %s1193_s18  ;;  %p152_p4 = scmp.eq.s32.totalorder %s1069_s23, 1 }
   0x8   : > { %s1280_s27 = scalar_select %p133_p1, %s1201_s20, %s135_s25  }
   0x9   : > { %p1282_p5 = por %p146_p2, %p145_p0  ;;  %p1286_p6 = por %p152_p4, %p151_p3 }
   0xa   : > { %p1072_p7 = scmp.ge.s32.totalorder %s1205_s21, 1  ;;  %p190_p8 = scmp.lt.s32.totalorder %s1205_s21, 3 }
   0xc   : > { %p191_p9 = pnand %p1072_p7, %p190_p8 }
   0xd   : > { %p217_p10 = scmp.lt.s32.totalorder (!%p191_p9), %s1265_s22, 1  ;;  %s1207_s10 = smov (!%p191_p9), 127  }
   0xe   : > { %194 = sbr.rel (%p191_p9) target bundleno = 1038 (0x40e), region = 40  ;;  %s1209_s11 = smov (!%p191_p9), 126  }
   0xf   : > { %s1210_s14 = smov (!%p191_p9), 125   ;;  %s1211_s15 = smov (!%p191_p9), 124  }
  0x10   : > { %s215_s16 = sand.u32 (!%p191_p9), 1, %s1197_s19   ;;  %s1094_s17 = sshll.u32 (!%p191_p9), %s1265_s22, 4 }
  0x11   : > { %s216_s23 = scalar_lea.vmem (!%p191_p9), [#allocation2], %s215_s16  ;;  %s1002_s7 = scalar_lea.sflag (!%p191_p9), [#allocation3], %s215_s16 }
  0x12   : > { %s1014_s25 = sshll.u32 (!%p191_p9), %s216_s23, 4  ;;  %s1015_s25 = int_to_ptr.vmem [resolvable:$true] %s1014_s25 }
  0x13   : > { %s218_s30 = scalar_select %p217_p10, %s1265_s22, 1  ;;  %vm327_vm0 = vcmask 1045504   ;;  %v1208_v18 = vmov 0.0   ;;  %v240_v19 = vld [vmem:[%s1618_s1] sm:$0x7]  ;;  %vm323_vm1 = vcmask 572416  }
  0x14   : > { %396 = vmatprep.mubr.f32.mxu0 %v1208_v18  ;;  %474 = vmatprep.mubr.f32.mxu1 %v1208_v18  ;;  %vm297_vm2 = vcmask 1039360   ;;  %v1212_v35 = vmov 0   ;;  %v913_v44 = vld [vmem:[%s1619_s2] sm:$0x7]  ;;  %v1074_v48 = vld [vmem:[%s1618_s1 + $0x4] sm:$0x7] }
  0x15   : > { %s1097_s6 = smul.u32 144, %s218_s30  ;;  %1143 = vset.pattern.permute.xlu0 %v1212_v35  ;;  %1144 = vset.pattern.permute.xlu1 %v1212_v35  ;;  %vm519_vm3 = vcmask 1031168   ;;  %vm663_vm4 = vcmask 1022976   ;;  %vm807_vm5 = vcmask 1014784   ;;  %vm948_vm6 = vcmask 1042432   ;;  %s1145_s8 = scalar_lea.vmem %s1015_s25, 16 }
  0x16   : > { %vm950_vm7 = vcmask 26624   ;;  %vm972_vm8 = vcmask 1041409   ;;  %vm975_vm9 = vcmask 17408   ;;  %vm999_vm10 = vcmask 8192   ;;  %p1146_p11 = scmp.ne.s32.totalorder %s1015_s25, %s1145_s8 }
  0x17   : > { %s1297_s9 = scalar_lea.vmem %s1617_s0, %s1097_s6  ;;  %s1012_s6 = scalar_lea.hbm %s1622_s5, %s1094_s17 }
  0x18   : > { %v1300_v0 = vld [vmem:[%s1297_s9 + $0x80] sm:$0x3f]  ;;  %v1303_v1 = vld [vmem:[%s1297_s9 + $0x70] sm:$0xff]  ;;  %v1310_v2 = vld [vmem:[%s1297_s9 + $0x88] sm:$0x3f]  ;;  %p1147_p12 = pnand %p1146_p11, %p1282_p5 }
  0x19   : > { %293 = vrot.lane.b32.xlu0 %v1300_v0, %s1207_s10  ;;  %289 = vrot.lane.b32.xlu1 %v1303_v1, %s1207_s10  ;;  %v1313_v3 = vld [vmem:[%s1297_s9 + $0x78] sm:$0xff]  ;;  %v1325_v4 = vld [vmem:[%s1297_s9 + $0x68] sm:$0xff] }
  0x1a   : > { %1078 = vmatprep.subr.msk.mxu1 %vm327_vm0, %v1310_v2  ;;  %v1328_v5 = vld [vmem:[%s1297_s9 + $0x60] sm:$0xff]  ;;  %v1338_v6 = vld [vmem:[%s1297_s9 + $0x58] sm:$0xff]  ;;  %v1341_v7 = vld [vmem:[%s1297_s9 + $0x50] sm:$0xff]  ;;  %p1148_p13 = pneg %p1147_p12 }
  0x1b   : > { %1079 = vmatpush1.msk.msra.mxu1 %vm327_vm0, %v1300_v0  ;;  %v1345_v8 = vld [vmem:[%s1297_s9 + $0x48] sm:$0xff]  ;;  %v1354_v9 = vld [vmem:[%s1297_s9 + $0x40] sm:$0xff]  ;;  %v1357_v10 = vld [vmem:[%s1297_s9 + $0x38] sm:$0xff] }
  0x1c   : > { %426 = vmatprep.subr.mxu1 %v1313_v3  ;;  %v1361_v11 = vld [vmem:[%s1297_s9 + $0x30] sm:$0xff]  ;;  %v1370_v12 = vld [vmem:[%s1297_s9 + $0x28] sm:$0xff]  ;;  %v1373_v13 = vld [vmem:[%s1297_s9 + $0x20] sm:$0xff] }
  0x1d   : > { %295 = vrot.lane.b32.xlu0 %v1310_v2, %s1207_s10  ;;  %291 = vrot.lane.b32.xlu1 %v1313_v3, %s1207_s10  ;;  %v1377_v14 = vld [vmem:[%s1297_s9 + $0x18] sm:$0xff]  ;;  %v1386_v15 = vld [vmem:[%s1297_s9 + $0x10] sm:$0xff] }
  0x1e   : > { %427 = vmatpush1.msra.mxu1 %v1303_v1  ;;  %v1389_v16 = vld [vmem:[%s1297_s9 + $0x8] sm:$0xff]  ;;  %v1393_v17 = vld [vmem:[%s1297_s9] sm:$0xff]  ;;  %s1213_s9 = smov [#allocation2]  }
  0x1f   : > { %428 = vmatprep.subr.mxu1 %v1325_v4 }
  0x20   : > { %429 = vmatpush1.msra.mxu1 %v1328_v5 }
  0x21   : > { %287 = vrot.lane.b32.xlu1 %v1325_v4, %s1207_s10  ;;  %285 = vrot.lane.b32.xlu0 %v1328_v5, %s1207_s10 }
  0x22   : > { %430 = vmatprep.subr.mxu1 %v1338_v6 }
  0x23   : > { %431 = vmatpush1.msra.mxu1 %v1341_v7 }
  0x24   : > { %432 = vmatprep.subr.mxu1 %v1345_v8 }
  0x25   : > { %283 = vrot.lane.b32.xlu1 %v1338_v6, %s1207_s10  ;;  %281 = vrot.lane.b32.xlu0 %v1341_v7, %s1207_s10 }
  0x26   : > { %433 = vmatpush1.msra.mxu1 %v1354_v9 }
  0x27   : > { %434 = vmatprep.subr.mxu1 %v1357_v10 }
  0x28   : > { %435 = vmatpush1.msra.mxu1 %v1361_v11 }
  0x29   : > { %279 = vrot.lane.b32.xlu1 %v1345_v8, %s1207_s10  ;;  %277 = vrot.lane.b32.xlu0 %v1354_v9, %s1207_s10 }
  0x2a   : > { %436 = vmatprep.subr.mxu1 %v1370_v12 }
  0x2b   : > { %437 = vmatpush1.msra.mxu1 %v1373_v13 }
  0x2c   : > { %438 = vmatprep.subr.mxu1 %v1377_v14 }
  0x2d   : > { %275 = vrot.lane.b32.xlu1 %v1357_v10, %s1207_s10  ;;  %273 = vrot.lane.b32.xlu0 %v1361_v11, %s1207_s10 }
  0x2e   : > { %439 = vmatpush1.msra.mxu1 %v1386_v15 }
  0x2f   : > { %440 = vmatprep.subr.mxu1 %v1389_v16 }
  0x30   : > { %441 = vmatpush1.msra.mxu1 %v1393_v17 }
  0x31   : > { %271 = vrot.lane.b32.xlu1 %v1370_v12, %s1207_s10  ;;  %269 = vrot.lane.b32.xlu0 %v1373_v13, %s1207_s10 }
  0x32   : > { %1080 = vmatmul.mubr.msk.f32.vlgmr.msra.gmra.mxu1 %vm323_vm1, %v240_v19 }
  0x33   : > { %760 = vmatprep.mubr.f32.mxu1 %v1208_v18 }
  0x35   : > { %267 = vrot.lane.b32.xlu1 %v1377_v14, %s1207_s10  ;;  %265 = vrot.lane.b32.xlu0 %v1386_v15, %s1207_s10 }
  0x39   : > { %263 = vrot.lane.b32.xlu1 %v1389_v16, %s1207_s10  ;;  %261 = vrot.lane.b32.xlu0 %v1393_v17, %s1207_s10 }
  0x3d   : > { %517 = vrot.lane.b32.xlu1 %v1310_v2, %s1209_s11  ;;  %515 = vrot.lane.b32.xlu0 %v1300_v0, %s1209_s11 }
  0x41   : > { %513 = vrot.lane.b32.xlu1 %v1313_v3, %s1209_s11  ;;  %511 = vrot.lane.b32.xlu0 %v1303_v1, %s1209_s11 }
  0x45   : > { %509 = vrot.lane.b32.xlu1 %v1325_v4, %s1209_s11  ;;  %507 = vrot.lane.b32.xlu0 %v1328_v5, %s1209_s11 }
  0x49   : > { %505 = vrot.lane.b32.xlu1 %v1338_v6, %s1209_s11  ;;  %503 = vrot.lane.b32.xlu0 %v1341_v7, %s1209_s11 }
  0x4d   : > { %501 = vrot.lane.b32.xlu1 %v1345_v8, %s1209_s11  ;;  %499 = vrot.lane.b32.xlu0 %v1354_v9, %s1209_s11 }
  0x51   : > { %497 = vrot.lane.b32.xlu1 %v1357_v10, %s1209_s11  ;;  %495 = vrot.lane.b32.xlu0 %v1361_v11, %s1209_s11 }
  0x55   : > { %493 = vrot.lane.b32.xlu1 %v1370_v12, %s1209_s11  ;;  %491 = vrot.lane.b32.xlu0 %v1373_v13, %s1209_s11 }
  0x59   : > { %489 = vrot.lane.b32.xlu1 %v1377_v14, %s1209_s11  ;;  %487 = vrot.lane.b32.xlu0 %v1386_v15, %s1209_s11 }
  0x5d   : > { %485 = vrot.lane.b32.xlu1 %v1389_v16, %s1209_s11  ;;  %483 = vrot.lane.b32.xlu0 %v1393_v17, %s1209_s11  ;;  %s1149_s11 = sshll.u32 %s1213_s9, 4  ;;  %s1150_s11 = int_to_ptr.vmem [resolvable:$false] %s1149_s11 }
  0x5e   : > { %s1151_s22 = scalar_lea.vmem %s1150_s11, 32  ;;  %p1152_p0 = scmp.lt.s32.totalorder %s1015_s25, %s1150_s11 }
  0x5f   : > { %p1153_p1 = scmp.lt.s32.totalorder %s1151_s22, %s1145_s8 }
  0x61   : > { %661 = vrot.lane.b32.xlu1 %v1310_v2, %s1210_s14  ;;  %659 = vrot.lane.b32.xlu0 %v1300_v0, %s1210_s14  ;;  %p1154_p2 = por %p1153_p1, %p1152_p0 }
  0x63   : > { %p1155_p3 = pnand %p1154_p2, %p1148_p13 }
  0x65   : > { %657 = vrot.lane.b32.xlu1 %v1313_v3, %s1210_s14  ;;  %655 = vrot.lane.b32.xlu0 %v1303_v1, %s1210_s14 }
  0x69   : > { %805 = vrot.lane.b32.xlu1 %v1310_v2, %s1211_s15  ;;  %803 = vrot.lane.b32.xlu0 %v1300_v0, %s1211_s15 }
  0x6d   : > { %653 = vrot.lane.b32.xlu1 %v1325_v4, %s1210_s14  ;;  %651 = vrot.lane.b32.xlu0 %v1328_v5, %s1210_s14 }
  0x71   : > { %801 = vrot.lane.b32.xlu1 %v1313_v3, %s1211_s15  ;;  %799 = vrot.lane.b32.xlu0 %v1303_v1, %s1211_s15 }
  0x75   : > { %649 = vrot.lane.b32.xlu1 %v1338_v6, %s1210_s14  ;;  %647 = vrot.lane.b32.xlu0 %v1341_v7, %s1210_s14 }
  0x79   : > { %797 = vrot.lane.b32.xlu1 %v1325_v4, %s1211_s15  ;;  %795 = vrot.lane.b32.xlu0 %v1328_v5, %s1211_s15 }
  0x7d   : > { %645 = vrot.lane.b32.xlu1 %v1345_v8, %s1210_s14  ;;  %643 = vrot.lane.b32.xlu0 %v1354_v9, %s1210_s14 }
  0x81   : > { %793 = vrot.lane.b32.xlu1 %v1338_v6, %s1211_s15  ;;  %791 = vrot.lane.b32.xlu0 %v1341_v7, %s1211_s15 }
  0x85   : > { %641 = vrot.lane.b32.xlu1 %v1357_v10, %s1210_s14  ;;  %639 = vrot.lane.b32.xlu0 %v1361_v11, %s1210_s14 }
  0x89   : > { %789 = vrot.lane.b32.xlu1 %v1345_v8, %s1211_s15  ;;  %787 = vrot.lane.b32.xlu0 %v1354_v9, %s1211_s15 }
  0x8b   : > { %v294_v20 = vpop.permute.xlu0 %293  ;;  %v290_v21 = vpop.permute.xlu1 %289 }
  0x8d   : > { %637 = vrot.lane.b32.xlu1 %v1370_v12, %s1210_s14  ;;  %635 = vrot.lane.b32.xlu0 %v1373_v13, %s1210_s14 }
  0x8f   : > { %v296_v22 = vpop.permute.xlu0 %295  ;;  %v292_v23 = vpop.permute.xlu1 %291 }
  0x90   : > { %1075 = vmatprep.subr.msk.mxu0 %vm327_vm0, %v296_v22  ;;  %v306_v24 = vsel %vm297_vm2, %v294_v20, %v296_v22  ;;  %v305_v25 = vsel %vm297_vm2, %v290_v21, %v292_v23 }
  0x91   : > { %1076 = vmatpush1.msk.msra.mxu0 %vm327_vm0, %v306_v24  ;;  %785 = vrot.lane.b32.xlu1 %v1357_v10, %s1211_s15 }
  0x92   : > { %783 = vrot.lane.b32.xlu0 %v1361_v11, %s1211_s15  ;;  %348 = vmatprep.subr.mxu0 %v292_v23 }
  0x93   : > { %349 = vmatpush1.msra.mxu0 %v305_v25  ;;  %v288_v26 = vpop.permute.xlu1 %287  ;;  %v286_v27 = vpop.permute.xlu0 %285 }
  0x94   : > { %350 = vmatprep.subr.mxu0 %v288_v26  ;;  %v304_v28 = vsel %vm297_vm2, %v286_v27, %v288_v26 }
  0x95   : > { %351 = vmatpush1.msra.mxu0 %v304_v28  ;;  %633 = vrot.lane.b32.xlu1 %v1377_v14, %s1210_s14 }
  0x96   : > { %631 = vrot.lane.b32.xlu0 %v1386_v15, %s1210_s14 }
  0x97   : > { %v284_v29 = vpop.permute.xlu1 %283  ;;  %v282_v30 = vpop.permute.xlu0 %281 }
  0x98   : > { %352 = vmatprep.subr.mxu0 %v284_v29  ;;  %v303_v31 = vsel %vm297_vm2, %v282_v30, %v284_v29 }
  0x99   : > { %353 = vmatpush1.msra.mxu0 %v303_v31  ;;  %781 = vrot.lane.b32.xlu1 %v1370_v12, %s1211_s15  ;;  %v1081_v12 = vld [vmem:[%s1618_s1 + $0x8] sm:$0x7] }
  0x9a   : > { %779 = vrot.lane.b32.xlu0 %v1373_v13, %s1211_s15 }
  0x9b   : > { %v280_v32 = vpop.permute.xlu1 %279  ;;  %v278_v33 = vpop.permute.xlu0 %277 }
  0x9c   : > { %354 = vmatprep.subr.mxu0 %v280_v32  ;;  %v302_v34 = vsel %vm297_vm2, %v278_v33, %v280_v32 }
  0x9d   : > { %355 = vmatpush1.msra.mxu0 %v302_v34  ;;  %629 = vrot.lane.b32.xlu1 %v1389_v16, %s1210_s14 }
  0x9e   : > { %627 = vrot.lane.b32.xlu0 %v1393_v17, %s1210_s14 }
  0x9f   : > { %v276_v36 = vpop.permute.xlu1 %275  ;;  %v274_v37 = vpop.permute.xlu0 %273 }
  0xa0   : > { %356 = vmatprep.subr.mxu0 %v276_v36  ;;  %v301_v38 = vsel %vm297_vm2, %v274_v37, %v276_v36 }
  0xa1   : > { %357 = vmatpush1.msra.mxu0 %v301_v38  ;;  %777 = vrot.lane.b32.xlu1 %v1377_v14, %s1211_s15 }
  0xa2   : > { %775 = vrot.lane.b32.xlu0 %v1386_v15, %s1211_s15 }
  0xa3   : > { %v272_v39 = vpop.permute.xlu1 %271  ;;  %v270_v40 = vpop.permute.xlu0 %269 }
  0xa4   : > { %358 = vmatprep.subr.mxu0 %v272_v39  ;;  %v300_v41 = vsel %vm297_vm2, %v270_v40, %v272_v39 }
  0xa5   : > { %359 = vmatpush1.msra.mxu0 %v300_v41  ;;  %773 = vrot.lane.b32.xlu1 %v1389_v16, %s1211_s15 }
  0xa6   : > { %771 = vrot.lane.b32.xlu0 %v1393_v17, %s1211_s15 }
  0xa7   : > { %v268_v42 = vpop.permute.xlu1 %267  ;;  %v266_v43 = vpop.permute.xlu0 %265 }
  0xa8   : > { %360 = vmatprep.subr.mxu0 %v268_v42  ;;  %v299_v45 = vsel %vm297_vm2, %v266_v43, %v268_v42 }
  0xa9   : > { %361 = vmatpush1.msra.mxu0 %v299_v45 }
  0xaa   : > { %916 = vperm.xlu0 %1143, %v913_v44  }
  0xab   : > { %v264_v46 = vpop.permute.xlu1 %263  ;;  %v262_v47 = vpop.permute.xlu0 %261 }
  0xac   : > { %362 = vmatprep.subr.mxu0 %v264_v46  ;;  %v298_v49 = vsel %vm297_vm2, %v262_v47, %v264_v46 }
  0xad   : > { %363 = vmatpush1.msra.mxu0 %v298_v49 }
  0xae   : > { %1077 = vmatmul.mubr.msk.f32.vlgmr.msra.gmra.mxu0 %vm323_vm1, %v1074_v48 }
  0xaf   : > { %v518_v50 = vpop.permute.xlu1 %517  ;;  %v516_v51 = vpop.permute.xlu0 %515  ;;  %616 = vmatprep.mubr.f32.mxu0 %v1208_v18 }
  0xb0   : > { %v528_v52 = vsel %vm519_vm3, %v516_v51, %v518_v50  ;;  %1082 = vmatprep.subr.msk.mxu0 %vm327_vm0, %v518_v50 }
  0xb1   : > { %1083 = vmatpush1.msk.msra.mxu0 %vm327_vm0, %v528_v52 }
  0xb3   : > { %v514_v53 = vpop.permute.xlu1 %513  ;;  %v512_v54 = vpop.permute.xlu0 %511 }
  0xb4   : > { %v527_v55 = vsel %vm519_vm3, %v512_v54, %v514_v53  ;;  %568 = vmatprep.subr.mxu0 %v514_v53 }
  0xb5   : > { %569 = vmatpush1.msra.mxu0 %v527_v55 }
  0xb7   : > { %v510_v56 = vpop.permute.xlu1 %509  ;;  %v508_v57 = vpop.permute.xlu0 %507 }
  0xb8   : > { %v526_v58 = vsel %vm519_vm3, %v508_v57, %v510_v56  ;;  %570 = vmatprep.subr.mxu0 %v510_v56 }
  0xb9   : > { %571 = vmatpush1.msra.mxu0 %v526_v58 }
  0xbb   : > { %v506_v59 = vpop.permute.xlu1 %505  ;;  %v504_v60 = vpop.permute.xlu0 %503 }
  0xbc   : > { %v525_v61 = vsel %vm519_vm3, %v504_v60, %v506_v59  ;;  %572 = vmatprep.subr.mxu0 %v506_v59 }
  0xbd   : > { %573 = vmatpush1.msra.mxu0 %v525_v61  ;;  %v1085_v61 = vld [vmem:[%s1618_s1 + $0xc] sm:$0x7] }
  0xbf   : > { %v502_v62 = vpop.permute.xlu1 %501  ;;  %v500_v63 = vpop.permute.xlu0 %499 }
  0xc0   : > { %v524_v0 = vsel %vm519_vm3, %v500_v63, %v502_v62  ;;  %574 = vmatprep.subr.mxu0 %v502_v62 }
  0xc1   : > { %575 = vmatpush1.msra.mxu0 %v524_v0 }
  0xc3   : > { %v498_v1 = vpop.permute.xlu1 %497  ;;  %v496_v2 = vpop.permute.xlu0 %495 }
  0xc4   : > { %v523_v3 = vsel %vm519_vm3, %v496_v2, %v498_v1  ;;  %576 = vmatprep.subr.mxu0 %v498_v1 }
  0xc5   : > { %577 = vmatpush1.msra.mxu0 %v523_v3 }
  0xc7   : > { %v494_v4 = vpop.permute.xlu1 %493  ;;  %v492_v5 = vpop.permute.xlu0 %491 }
  0xc8   : > { %v522_v6 = vsel %vm519_vm3, %v492_v5, %v494_v4  ;;  %578 = vmatprep.subr.mxu0 %v494_v4  ;;  %v1089_v4 = vld [vmem:[%s1618_s1 + $0x10] sm:$0x7] }
  0xc9   : > { %579 = vmatpush1.msra.mxu0 %v522_v6 }
  0xcb   : > { %v490_v7 = vpop.permute.xlu1 %489  ;;  %v488_v8 = vpop.permute.xlu0 %487 }
  0xcc   : > { %v521_v9 = vsel %vm519_vm3, %v488_v8, %v490_v7  ;;  %580 = vmatprep.subr.mxu0 %v490_v7 }
  0xcd   : > { %581 = vmatpush1.msra.mxu0 %v521_v9 }
  0xcf   : > { %v486_v10 = vpop.permute.xlu1 %485  ;;  %v484_v11 = vpop.permute.xlu0 %483 }
  0xd0   : > { %v520_v13 = vsel %vm519_vm3, %v484_v11, %v486_v10  ;;  %582 = vmatprep.subr.mxu0 %v486_v10 }
  0xd1   : > { %583 = vmatpush1.msra.mxu0 %v520_v13 }
  0xd2   : > { %1084 = vmatmul.mubr.msk.f32.vlgmr.msra.gmra.mxu0 %vm323_vm1, %v1081_v12 }
  0xd3   : > { %v662_v14 = vpop.permute.xlu1 %661  ;;  %v660_v15 = vpop.permute.xlu0 %659  ;;  %904 = vmatprep.mubr.f32.mxu0 %v1208_v18 }
  0xd4   : > { %v672_v16 = vsel %vm663_vm4, %v660_v15, %v662_v14  ;;  %1086 = vmatprep.subr.msk.mxu1 %vm327_vm0, %v662_v14 }
  0xd5   : > { %1087 = vmatpush1.msk.msra.mxu1 %vm327_vm0, %v672_v16 }
  0xd7   : > { %v658_v17 = vpop.permute.xlu1 %657  ;;  %v656_v19 = vpop.permute.xlu0 %655 }
  0xd8   : > { %v671_v20 = vsel %vm663_vm4, %v656_v19, %v658_v17  ;;  %712 = vmatprep.subr.mxu1 %v658_v17 }
  0xd9   : > { %713 = vmatpush1.msra.mxu1 %v671_v20 }
  0xdb   : > { %v806_v21 = vpop.permute.xlu1 %805  ;;  %v804_v22 = vpop.permute.xlu0 %803 }
  0xdc   : > { %v816_v23 = vsel %vm807_vm5, %v804_v22, %v806_v21  ;;  %1090 = vmatprep.subr.msk.mxu0 %vm327_vm0, %v806_v21 }
  0xdd   : > { %1091 = vmatpush1.msk.msra.mxu0 %vm327_vm0, %v816_v23 }
  0xdf   : > { %v654_v18 = vpop.permute.xlu1 %653  ;;  %v652_v24 = vpop.permute.xlu0 %651 }
  0xe0   : > { %v670_v25 = vsel %vm663_vm4, %v652_v24, %v654_v18  ;;  %714 = vmatprep.subr.mxu1 %v654_v18 }
  0xe1   : > { %715 = vmatpush1.msra.mxu1 %v670_v25 }
  0xe3   : > { %v802_v26 = vpop.permute.xlu1 %801  ;;  %v800_v27 = vpop.permute.xlu0 %799 }
  0xe4   : > { %v815_v28 = vsel %vm807_vm5, %v800_v27, %v802_v26  ;;  %856 = vmatprep.subr.mxu0 %v802_v26 }
  0xe5   : > { %857 = vmatpush1.msra.mxu0 %v815_v28 }
  0xe7   : > { %v650_v29 = vpop.permute.xlu1 %649  ;;  %v648_v30 = vpop.permute.xlu0 %647 }
  0xe8   : > { %v669_v31 = vsel %vm663_vm4, %v648_v30, %v650_v29  ;;  %716 = vmatprep.subr.mxu1 %v650_v29 }
  0xe9   : > { %717 = vmatpush1.msra.mxu1 %v669_v31 }
  0xeb   : > { %v798_v32 = vpop.permute.xlu1 %797  ;;  %v796_v33 = vpop.permute.xlu0 %795 }
  0xec   : > { %v814_v34 = vsel %vm807_vm5, %v796_v33, %v798_v32  ;;  %858 = vmatprep.subr.mxu0 %v798_v32 }
  0xed   : > { %859 = vmatpush1.msra.mxu0 %v814_v34  ;;  %v935_v34 = vld [vmem:[%s1620_s3 + $0x8] sm:$0x77] }
  0xef   : > { %v646_v35 = vpop.permute.xlu1 %645  ;;  %v644_v36 = vpop.permute.xlu0 %643 }
  0xf0   : > { %v668_v37 = vsel %vm663_vm4, %v644_v36, %v646_v35  ;;  %718 = vmatprep.subr.mxu1 %v646_v35  ;;  %v934_v35 = vld [vmem:[%s1620_s3] sm:$0x77] }
  0xf1   : > { %719 = vmatpush1.msra.mxu1 %v668_v37 }
  0xf2   : > { %v476_v8 = vpop.f32.mrf.mxu1 }
  0xf3   : > { %v794_v38 = vpop.permute.xlu1 %793  ;;  %v792_v39 = vpop.permute.xlu0 %791 }
  0xf4   : > { %v813_v40 = vsel %vm807_vm5, %v792_v39, %v794_v38  ;;  %860 = vmatprep.subr.mxu0 %v794_v38  ;;  %v478_v9 = vpop.f32.mrf.mxu1 }
  0xf5   : > { %861 = vmatpush1.msra.mxu0 %v813_v40 }
  0xf7   : > { %v642_v41 = vpop.permute.xlu1 %641  ;;  %v640_v42 = vpop.permute.xlu0 %639 }
  0xf8   : > { %v667_v43 = vsel %vm663_vm4, %v640_v42, %v642_v41  ;;  %720 = vmatprep.subr.mxu1 %v642_v41 }
  0xf9   : > { %721 = vmatpush1.msra.mxu1 %v667_v43 }
  0xfb   : > { %v790_v44 = vpop.permute.xlu1 %789  ;;  %v788_v45 = vpop.permute.xlu0 %787 }
  0xfc   : > { %v812_v46 = vsel %vm807_vm5, %v788_v45, %v790_v44  ;;  %862 = vmatprep.subr.mxu0 %v790_v44 }
  0xfd   : > { %863 = vmatpush1.msra.mxu0 %v812_v46 }
  0xff   : > { %v638_v47 = vpop.permute.xlu1 %637  ;;  %v636_v48 = vpop.permute.xlu0 %635 }
 0x100   : > { %v666_v49 = vsel %vm663_vm4, %v636_v48, %v638_v47  ;;  %722 = vmatprep.subr.mxu1 %v638_v47  ;;  %v962_v47 = vlaneseq }
 0x101   : > { %723 = vmatpush1.msra.mxu1 %v666_v49 }
 0x102   : > { %v963_v48 = vand.u32 127, %v962_v47  ;;  %v965_v49 = vshrl.u32 %v962_v47, 7 }
 0x103   : > { %v786_v50 = vpop.permute.xlu1 %785 }
 0x104   : > { %v784_v51 = vpop.permute.xlu0 %783  ;;  %864 = vmatprep.subr.mxu0 %v786_v50 }
 0x105   : > { %v811_v52 = vsel %vm807_vm5, %v784_v51, %v786_v50  ;;  %v966_v50 = vsub.s32 %v963_v48, %v965_v49 }
 0x106   : > { %865 = vmatpush1.msra.mxu0 %v811_v52 }
 0x107   : > { %v634_v53 = vpop.permute.xlu1 %633 }
 0x108   : > { %v632_v54 = vpop.permute.xlu0 %631  ;;  %724 = vmatprep.subr.mxu1 %v634_v53 }
 0x109   : > { %v665_v55 = vsel %vm663_vm4, %v632_v54, %v634_v53 }
 0x10a   : > { %725 = vmatpush1.msra.mxu1 %v665_v55 }
 0x10b   : > { %v782_v56 = vpop.permute.xlu1 %781 }
 0x10c   : > { %v780_v57 = vpop.permute.xlu0 %779  ;;  %866 = vmatprep.subr.mxu0 %v782_v56 }
 0x10d   : > { %v810_v58 = vsel %vm807_vm5, %v780_v57, %v782_v56  ;;  %v1093_v57 = vld [vmem:[%s1621_s4] ss:$0 sm:$0xff] }
 0x10e   : > { %867 = vmatpush1.msra.mxu0 %v810_v58 }
 0x10f   : > { %v630_v59 = vpop.permute.xlu1 %629 }
 0x110   : > { %v628_v60 = vpop.permute.xlu0 %627  ;;  %726 = vmatprep.subr.mxu1 %v630_v59 }
 0x111   : > { %v664_v62 = vsel %vm663_vm4, %v628_v60, %v630_v59 }
 0x112   : > { %727 = vmatpush1.msra.mxu1 %v664_v62 }
 0x113   : > { %1088 = vmatmul.mubr.msk.f32.vlgmr.msra.gmra.mxu1 %vm323_vm1, %v1085_v61  ;;  %v778_v63 = vpop.permute.xlu1 %777 }
 0x114   : > { %v776_v0 = vpop.permute.xlu0 %775  ;;  %868 = vmatprep.subr.mxu0 %v778_v63 }
 0x115   : > { %v809_v1 = vsel %vm807_vm5, %v776_v0, %v778_v63 }
 0x116   : > { %869 = vmatpush1.msra.mxu0 %v809_v1 }
 0x117   : > { %v774_v2 = vpop.permute.xlu1 %773 }
 0x118   : > { %v772_v3 = vpop.permute.xlu0 %771  ;;  %870 = vmatprep.subr.mxu0 %v774_v2 }
 0x119   : > { %v808_v5 = vsel %vm807_vm5, %v772_v3, %v774_v2 }
 0x11a   : > { %871 = vmatpush1.msra.mxu0 %v808_v5 }
 0x11b   : > { %1092 = vmatmul.mubr.msk.f32.vlgmr.msra.gmra.mxu0 %vm323_vm1, %v1089_v4 }
 0x125   : > { %v917_v21 = vpop.permute.xlu0 %916 }
 0x16e   : > { %v398_v6 = vpop.f32.mrf.mxu0 }
 0x16f   : > { %v477_v11 = vadd.f32 %v476_v8, %v398_v6 }
 0x170   : > { %v400_v7 = vpop.f32.mrf.mxu0 }
 0x171   : > { %v479_v13 = vadd.f32 %v478_v9, %v400_v7 }
 0x192   : > { %v618_v10 = vpop.f32.mrf.mxu0 }
 0x193   : > { %v623_v15 = vadd.f32 %v618_v10, %v477_v11 }
 0x194   : > { %v620_v14 = vpop.f32.mrf.mxu0 }
 0x195   : > { %v624_v17 = vadd.f32 %v620_v14, %v479_v13 }
 0x1d3   : > { %v762_v12 = vpop.f32.mrf.mxu1 }
 0x1d4   : > { %v767_v19 = vadd.f32 %v762_v12, %v623_v15 }
 0x1d5   : > { %v764_v16 = vpop.f32.mrf.mxu1 }
 0x1d6   : > { %v768_v22 = vadd.f32 %v764_v16, %v624_v17 }
 0x1db   : > { %v906_v20 = vpop.f32.mrf.mxu0 }
 0x1dc   : > { %v911_v23 = vadd.f32 %v906_v20, %v767_v19 }
 0x1dd   : > { %v908_v18 = vpop.f32.mrf.mxu0 }
 0x1de   : > { %v912_v24 = vadd.f32 %v908_v18, %v768_v22  ;;  %v919_v25 = vadd.f32 %v917_v21, %v911_v23 }
 0x1e0   : > { %v920_v26 = vadd.f32 %v917_v21, %v912_v24  ;;  %v921_v27 = vmax.f32 %v919_v25, 0.0 }
 0x1e2   : > { %925 = vrot.lane.b32.xlu1 %v921_v27, %s1207_s10  ;;  %v922_v28 = vmax.f32 %v920_v26, 0.0 }
 0x1e6   : > { %927 = vrot.lane.b32.xlu1 %v922_v28, %s1207_s10 }
 0x254   : > { %v926_v29 = vpop.permute.xlu1 %925 }
 0x258   : > { %v928_v30 = vpop.permute.xlu1 %927 }
 0x259   : > { %v929_v31 = vsel %vm297_vm2, %v926_v29, %v928_v30  ;;  %v933_v32 = vmax.f32 %v922_v28, %v928_v30 }
 0x25a   : > { %v932_v33 = vmax.f32 %v921_v27, %v929_v31 }
 0x25c   : > { %v938_v36 = vcombine.low %v932_v33, %v933_v32 }
 0x25e   : > { %v941_v37 = vmul.f32 %v938_v36, %v935_v34  ;;  %v940_v38 = vmul.f32 %v938_v36, %v934_v35 }
 0x260   : > { %v945_v39 = vcombine.high %v941_v37, %v941_v37  ;;  %v944_v40 = vcombine.high %v940_v38, %v940_v38  ;;  %v955_v41 = vsel %vm948_vm6, %v941_v37, 0.0  ;;  %v949_v43 = vsel %vm948_vm6, %v940_v38, 0.0 }
 0x262   : > { %v956_v42 = vsel %vm950_vm7, %v945_v39, 0.0  ;;  %v951_v44 = vsel %vm950_vm7, %v944_v40, 0.0 }
 0x263   : > { %v957_v45 = vadd.f32 %v956_v42, %v955_v41  ;;  %v952_v46 = vadd.f32 %v951_v44, %v949_v43 }
 0x265   : > { %958 = vadd.xlane.f32.xlu1 %v957_v45  ;;  %953 = vadd.xlane.f32.xlu0 %v952_v46 }
 0x2ee   : > { %v959_v51 = vpop.xlane.xlu1 %958  ;;  %v954_v52 = vpop.xlane.xlu0 %953 }
 0x2ef   : > { %v971_v53 = vrot.slane %v959_v51, %v966_v50  ;;  %v967_v54 = vrot.slane %v954_v52, %v966_v50 }
 0x2f1   : > { %v973_v55 = vsel %vm972_vm8, %v971_v53, %v967_v54 }
 0x2f2   : > { %v976_v56 = vsel %vm975_vm9, %v973_v55, 0.0 }
 0x2f3   : > { %977 = vadd.xlane.f32.xlu0 %v976_v56 }
 0x309   : > { %986 = vbcast.lane.b32.xlu0 %v1093_v57, 256 }
 0x37c   : > { %v978_v58 = vpop.xlane.xlu0 %977 }
 0x380   : > { %v987_v59 = vpop.permute.xlu0 %986 }
 0x381   : > { %v989_v60 = vadd.f32 %v987_v59, %v978_v58 }
 0x383   : > { %992 = vperm.xlu1 %1144, %v989_v60  }
 0x3fe   : > { %v993_v61 = vpop.permute.xlu1 %992 }
 0x3ff   : > { %v997_v62 = vrot.slane %v993_v61, %v966_v50 }
 0x401   : > { %1000 = vst.msk [vmem:[%s216_s23] sm:$0x1] %vm999_vm10, %v997_v62 }
 0x402   : > { %1158 = shalt.err (!%p1155_p3)
}
 0x403   : > { %s1159_s12 = scalar_lea.hbm %s1012_s6, 16  ;;  %s1163_s10 = scalar_lea.hbm %s1622_s5, 32 }
 0x404   : > { %p1160_p4 = scmp.ne.s32.totalorder %s1012_s6, %s1159_s12  ;;  %p1164_p9 = scmp.lt.s32.totalorder %s1012_s6, %s1622_s5 }
 0x405   : > { %p1165_p10 = scmp.lt.s32.totalorder %s1163_s10, %s1159_s12 }
 0x406   : > { %p1161_p7 = pnand %p1160_p4, %p1282_p5 }
 0x407   : > { %p1166_p11 = por %p1165_p10, %p1164_p9 }
 0x408   : > { %p1162_p8 = pneg %p1161_p7 }
 0x40a   : > { %p1167_p12 = pnand %p1166_p11, %p1162_p8 }
 0x40c   : > { %1170 = shalt.err (!%p1167_p12)
}
 0x40d   : > { %1098 = dma.vmem_to_hbm [thread:$0]  (%p1282_p5), %s1015_s25, 16, %s1012_s6, %s1002_s7  }
 0x40e PF: > { %p1104_p13 = scmp.ge.s32.totalorder %s1205_s21, 2  ;;  %s1026_s17 = sand.u32 1, %s1193_s18  }
 0x40f   : > { %s1027_s23 = scalar_lea.sflag [#allocation3], %s1026_s17 }
 0x410   : > { %p1101_p0 = pnand %p1104_p13, %p1286_p6 }
 0x412   : > { %p1102_p1 = pneg %p1101_p0 }
 0x414   : > { %1188 = dma.done.wait (%p1102_p1), %s1027_s23, 16  }
 0x415   : > { %1190 = vsyncadd (%p1102_p1), %s1027_s23, 4294967280  ;;  %p15_p2 = scmp.ge.s32.totalorder %s1269_s24, 4   ;;  %s1625_s18 = smov %s1197_s19 }
 0x416   : > { %s1626_s19 = smov %s1201_s20  ;;  %s1627_s20 = smov %s1280_s27 }
 0x417   : > { %s1628_s21 = smov %s1269_s24  ;;  %17 = sbr.rel (!%p15_p2) target bundleno = 3 (0x3), region = 79 }
 0x41c   :  { %1031 = vsyncpa [#allocation3], 1 }
 0x41d   :  { %1033 = vsyncpa [#allocation3 + $0x1], 1 }

</bundles_post_ra>
